<compile_context>
chip_gen: v6e
topology: v6e:2x2x1
jax: 0.10.0
libtpu: 0.0.40
codegen_flags: <defaults>
</compile_context>

<pallas_src>
import math

import jax
import jax.numpy as jnp
from jax import lax
from jax.experimental import pallas as pl
from jax.experimental.pallas import tpu as pltpu


_EPS = 1e-12  # PyTorch F.normalize default eps


def _round_up(x, m):
    return ((x + m - 1) // m) * m


def _l2_normalize(x, eps=_EPS):
    # PyTorch F.normalize: x / max(||x||_2, eps), computed in f32.
    x = x.astype(jnp.float32)
    sumsq = jnp.sum(x * x, axis=-1, keepdims=True)
    return x * lax.rsqrt(jnp.maximum(sumsq, eps * eps))


def _arc_margin_kernel(x_ref, w_ref, o_ref):
    # x_ref: (TB, IN) normalized feature tile (compute dtype, typically bf16)
    # w_ref: (TN, IN) normalized class-row tile (compute dtype)
    # o_ref: (TB, TN) cosine output tile
    # NT contraction over the last dim of both operands (no transpose through
    # the XLU); f32 accumulation on the MXU.
    o_ref[...] = lax.dot_general(
        x_ref[...],
        w_ref[...],
        dimension_numbers=(((1,), (1,)), ((), ())),
        preferred_element_type=jnp.float32,
    ).astype(o_ref.dtype)


def prepare_arc_margin_weight(weight, *, tile_n=1024, compute_dtype=jnp.bfloat16):
    """Normalize / pad / cast the class weights ONCE (per parameter update).

    Returns (w_prepared, tn): w_prepared has shape
    (round_up(OUT, tn), round_up(IN, 128)) in `compute_dtype`.
    """
    OUT, IN = weight.shape
    in_pad = _round_up(IN, 128)
    tn = min(tile_n, _round_up(OUT, 128))
    out_pad = _round_up(OUT, tn)

    w_n = _l2_normalize(weight)  # eps clamp preserved -> zero rows stay finite
    if (out_pad, in_pad) != (OUT, IN):
        w_n = jnp.pad(w_n, ((0, out_pad - OUT), (0, in_pad - IN)))
    return w_n.astype(compute_dtype), tn


def arc_margin_product_prepared(features, w_prepared, out_features, tn, *,
                                tile_b=512, out_dtype=jnp.float32):
    """cosine = normalize(features) @ w_prepared.T (weights already normalized)."""
    B, IN = features.shape
    out_pad, in_pad = w_prepared.shape
    assert in_pad >= IN and in_pad % 128 == 0, "prepared weight IN padding invalid"
    assert out_pad % tn == 0, "prepared weight OUT padding inconsistent with tn"

    compute_dtype = w_prepared.dtype

    # Feature normalization in plain JAX (B x IN elementwise; XLA fuses it).
    x_n = _l2_normalize(features).astype(compute_dtype)

    # Batch tiling with minimal edge padding (at most 8*n_tiles - 1 pad rows).
    n_bt = -(-B // tile_b)
    tb = _round_up(-(-B // n_bt), 8)
    b_pad = n_bt * tb
    if (b_pad, in_pad) != (B, IN):
        x_n = jnp.pad(x_n, ((0, b_pad - B), (0, in_pad - IN)))

    grid = (b_pad // tb, out_pad // tn)

    itemsize = jnp.dtype(compute_dtype).itemsize
    out_itemsize = jnp.dtype(out_dtype).itemsize
    # Per-step VMEM including double buffering; size the scoped limit from it
    # (>= 32 MiB for headroom, capped at v7x's 64 MiB physical VMEM).
    vmem_bytes = 2 * (tb * in_pad * itemsize
                      + tn * in_pad * itemsize
                      + tb * tn * out_itemsize)
    vmem_limit = int(min(64 << 20, max(32 << 20, 2 * vmem_bytes)))

    cost = pl.CostEstimate(
        flops=2 * b_pad * out_pad * in_pad,
        transcendentals=0,
        bytes_accessed=(b_pad * in_pad * itemsize                 # features read
                        + grid[0] * out_pad * in_pad * itemsize   # weight per batch tile
                        + b_pad * out_pad * out_itemsize),        # output write
    )

    out = pl.pallas_call(
        _arc_margin_kernel,
        out_shape=jax.ShapeDtypeStruct((b_pad, out_pad), out_dtype),
        grid_spec=pltpu.PrefetchScalarGridSpec(
            num_scalar_prefetch=0,
            grid=grid,
            in_specs=[
                # features: one batch tile, resident across the inner OUT axis
                pl.BlockSpec((tb, in_pad), lambda i, j: (i, 0)),
                # weight: one tile of `tn` (already-normalized) class rows
                pl.BlockSpec((tn, in_pad), lambda i, j: (j, 0)),
            ],
            out_specs=pl.BlockSpec((tb, tn), lambda i, j: (i, j)),
        ),
        compiler_params=pltpu.CompilerParams(
            # No cross-step state (normalization is hoisted out of the kernel),
            # so both grid axes are independent -> fully megacore-shardable.
            dimension_semantics=("parallel", "parallel"),
            vmem_limit_bytes=vmem_limit,
        ),
        cost_estimate=cost,
    )(x_n, w_prepared)

    return out[:B, :out_features]


def arc_margin_product(features, weight, *, tile_b=512, tile_n=1024,
                       out_dtype=jnp.float32, compute_dtype=jnp.bfloat16):
    """One-shot convenience: prepares the weight, then runs the kernel.

    In training/serving loops, call prepare_arc_margin_weight once per weight
    update and use arc_margin_product_prepared per forward call.
    """
    w_prep, tn = prepare_arc_margin_weight(
        weight, tile_n=tile_n, compute_dtype=compute_dtype)
    return arc_margin_product_prepared(
        features, w_prep, weight.shape[0], tn,
        tile_b=tile_b, out_dtype=out_dtype)


def arc_margin_reference(features, weight):
    eps = 1e-12
    x_n = features / jnp.maximum(
        jnp.linalg.norm(features, axis=-1, keepdims=True), eps)
    w_n = weight / jnp.maximum(
        jnp.linalg.norm(weight, axis=-1, keepdims=True), eps)
    return x_n @ w_n.T


if __name__ == "__main__":
    # Small shapes consistent with ArcMarginProduct(in_features, out_features)
    batch = 8
    in_features = 64
    out_features = 256

    key = jax.random.PRNGKey(0)
    k_feat, k_w = jax.random.split(key)

    features = jax.random.normal(k_feat, (batch, in_features), dtype=jnp.float32)

    # Deterministic parameter init mirroring reset_parameters():
    #   stdv = 1/sqrt(in_features); weight ~ U(-stdv, stdv)
    stdv = 1.0 / math.sqrt(in_features)
    weight = jax.random.uniform(
        k_w, (out_features, in_features), dtype=jnp.float32,
        minval=-stdv, maxval=stdv,
    )

    # Prepare weights once (as a real model would), then run the kernel.
    w_prep, tn = prepare_arc_margin_weight(weight)
    out = arc_margin_product_prepared(features, w_prep, out_features, tn)
    out = jax.block_until_ready(out)

    ref = arc_margin_reference(features, weight)
    assert out.shape == (batch, out_features)
    # bf16 MXU operands with f32 accumulation -> ~1e-3-level cosine error.
    assert jnp.allclose(out, ref, atol=1e-2, rtol=1e-2), "mismatch vs reference"

    print("KERNEL_OK")
</pallas_src>

<mosaic_0001>
module attributes {stable_mosaic.version = 11 : i64} {
  func.func @_arc_margin_kernel(%arg0: i32, %arg1: i32, %arg2: memref<8x128xbf16, #tpu.memory_space<vmem>>, %arg3: memref<256x128xbf16, #tpu.memory_space<vmem>>, %arg4: memref<8x256xf32, #tpu.memory_space<vmem>>) attributes {dimension_semantics = [#tpu.dimension_semantics<parallel>, #tpu.dimension_semantics<parallel>], iteration_bounds = array<i64: 1, 1>, scalar_prefetch = 0 : i64, scratch_operands = 0 : i64, tpu.core_type = #tpu.core_type<tc>, window_params = [{transform_indices = @transform_0, window_bounds = array<i64: 8, 128>}, {transform_indices = @transform_1, window_bounds = array<i64: 256, 128>}, {transform_indices = @transform_2, window_bounds = array<i64: 8, 256>}]} {
    %c0 = arith.constant 0 : index
    %c0_0 = arith.constant 0 : index
    %0 = vector.load %arg2[%c0, %c0_0] : memref<8x128xbf16, #tpu.memory_space<vmem>>, vector<8x128xbf16>
    %c0_1 = arith.constant 0 : index
    %c0_2 = arith.constant 0 : index
    %1 = vector.load %arg3[%c0_1, %c0_2] : memref<256x128xbf16, #tpu.memory_space<vmem>>, vector<256x128xbf16>
    %cst = arith.constant dense<0.000000e+00> : vector<8x256xf32>
    %2 = tpu.matmul %0, %1, %cst {dimension_numbers = #tpu.dot_dimension_numbers<[1], [1], [0], [0], [0, 0, 1, 0], [], []>} : vector<8x128xbf16>, vector<256x128xbf16>, vector<8x256xf32> -> vector<8x256xf32>
    %c0_3 = arith.constant 0 : index
    %c0_4 = arith.constant 0 : index
    %3 = vector.load %arg4[%c0_3, %c0_4] : memref<8x256xf32, #tpu.memory_space<vmem>>, vector<8x256xf32>
    tpu.vector_store %arg4[%c0_3, %c0_4], %2 {strides = array<i32>} : memref<8x256xf32, #tpu.memory_space<vmem>>, vector<8x256xf32>,
    return
  }
  func.func @transform_0(%arg0: i32, %arg1: i32) -> (i32, i32) {
    %c0_i32 = arith.constant 0 : i32
    %c0_i32_0 = arith.constant 0 : i32
    return %arg0, %c0_i32 : i32, i32
  }
  func.func @transform_1(%arg0: i32, %arg1: i32) -> (i32, i32) {
    %c0_i32 = arith.constant 0 : i32
    %c0_i32_0 = arith.constant 0 : i32
    return %arg1, %c0_i32 : i32, i32
  }
  func.func @transform_2(%arg0: i32, %arg1: i32) -> (i32, i32) {
    %c0_i32 = arith.constant 0 : i32
    return %arg0, %arg1 : i32, i32
  }
}

</mosaic_0001>

<bundles_post_ra>
// kernel: tpu_custom_call.1
= control target key start
LH: loop header
LB: loop body
LE: loop exit
PB: predicated region body
PF: predicated region fallthrough
CT: control target
= control target key end

     0   :  { %7 = vsyncpa [#allocation3], 0  ;;  %s377_s0 = inlined_call_operand.hbm [shape: bf16[8,128], index: 0, kind: input, shape index: {}]   ;;  %s378_s1 = inlined_call_operand.hbm [shape: bf16[256,128], index: 1, kind: input, shape index: {}]   ;;  %s379_s2 = inlined_call_operand.hbm [shape: f32[8,256], index: 2, kind: output, shape index: {}]  }
   0x1   :  { %8 = vsyncpa [#allocation6], 0 }
   0x2   :  { %9 = vsyncpa [#allocation4], 0  ;;  %s348_s9 = smov [#allocation2]   ;;  %s349_s11 = smov [#allocation5]  }
   0x3   :  { %s16_s10 = sshll.u32 %s348_s9, 4  ;;  %s25_s12 = sshll.u32 %s349_s11, 4  ;;  %s17_s10 = int_to_ptr.vmem [resolvable:$true] %s16_s10  ;;  %s26_s12 = int_to_ptr.vmem [resolvable:$true] %s25_s12 }
   0x4   :  { %s290_s13 = scalar_lea.vmem %s17_s10, 64  ;;  %p295_p1 = scmp.lt.s32.totalorder %s17_s10, %s17_s10 }
   0x5   :  { %p291_p0 = scmp.ne.s32.totalorder %s17_s10, %s290_s13  ;;  %p296_p2 = scmp.lt.s32.totalorder %s290_s13, %s290_s13 }
   0x7   :  { %p297_p3 = por %p296_p2, %p295_p1 }
   0x9   :  { %p298_p4 = pnand %p297_p3, %p291_p0 }
   0xb   :  { %301 = shalt.err (!%p298_p4)
}
   0xc   :  { %19 = dma.hbm_to_vmem [thread:$0]  %s377_s0, 64, %s17_s10, [#allocation3]  }
   0xd   :  { %s310_s16 = scalar_lea.vmem %s26_s12, 2048  ;;  %p315_p6 = scmp.lt.s32.totalorder %s26_s12, %s26_s12 }
   0xe   :  { %p311_p5 = scmp.ne.s32.totalorder %s26_s12, %s310_s16  ;;  %p316_p7 = scmp.lt.s32.totalorder %s310_s16, %s310_s16 }
  0x10   :  { %p317_p8 = por %p316_p7, %p315_p6 }
  0x12   :  { %p318_p9 = pnand %p317_p8, %p311_p5 }
  0x14   :  { %321 = shalt.err (!%p318_p9)
}
  0x15   :  { %s350_s17 = smov 64   ;;  %s351_s18 = smov 4  }
  0x16   :  { %31 = dma.hbm_to_vmem [thread:$0]  %s378_s1, 2048, %s26_s12, [#allocation6], %s350_s17, %s350_s17, %s351_s18  }
  0x17   :  { %342 = dma.done.wait [#allocation3], 64  }
  0x18   :  { %343 = vsyncadd [#allocation3], 4294967232 }
  0x19   :  { %344 = dma.done.wait [#allocation6], 2048  }
  0x1a   :  { %345 = vsyncadd [#allocation6], 4294965248  ;;  %v266_v0 = vld [vmem:[#allocation5 + $0x78] sm:$0xff]   ;;  %v268_v2 = vld [vmem:[#allocation5 + $0x70] sm:$0xff]   ;;  %s352_s0 = smov [#allocation7]  }
  0x1b   :  { %v267_v1 = vld [vmem:[#allocation5 + $0x38] sm:$0xff]   ;;  %243 = vmatprep.subr.bf16.mxu0 %v266_v0  ;;  %v269_v3 = vld [vmem:[#allocation5 + $0x30] sm:$0xff]   ;;  %v270_v4 = vld [vmem:[#allocation5 + $0x68] sm:$0xff]   ;;  %s217_s1 = sshll.u32 %s352_s0, 4  ;;  %s218_s1 = int_to_ptr.vmem [resolvable:$true] %s217_s1 }
  0x1c   :  { %244 = vmatpush3.bf16.xpose.msra.mxu0 %v267_v1  ;;  %v271_v5 = vld [vmem:[#allocation5 + $0x28] sm:$0xff]   ;;  %v272_v6 = vld [vmem:[#allocation5 + $0x60] sm:$0xff]   ;;  %v39_v7 = vld [vmem:[#allocation2] sm:$0xf]  ;;  %s322_s21 = scalar_lea.vmem %s218_s1, 256  ;;  %p327_p11 = scmp.lt.s32.totalorder %s218_s1, %s218_s1 }
  0x1d   :  { %245 = vmatprep.subr.bf16.mxu0 %v268_v2  ;;  %259 = vmatprep.mubr.bf16.mxu0 %v39_v7  ;;  %v273_v8 = vld [vmem:[#allocation5 + $0x20] sm:$0xff]   ;;  %v274_v9 = vld [vmem:[#allocation5 + $0x58] sm:$0xff]   ;;  %v276_v11 = vld [vmem:[#allocation5 + $0x50] sm:$0xff]   ;;  %p323_p10 = scmp.ne.s32.totalorder %s218_s1, %s322_s21  ;;  %p328_p12 = scmp.lt.s32.totalorder %s322_s21, %s322_s21 }
  0x1e   :  { %v275_v10 = vld [vmem:[#allocation5 + $0x18] sm:$0xff]   ;;  %v277_v12 = vld [vmem:[#allocation5 + $0x10] sm:$0xff]   ;;  %v278_v13 = vld [vmem:[#allocation5 + $0x48] sm:$0xff]  }
  0x1f   :  { %v279_v14 = vld [vmem:[#allocation5 + $0x8] sm:$0xff]   ;;  %v280_v15 = vld [vmem:[#allocation5 + $0x40] sm:$0xff]   ;;  %p329_p13 = por %p328_p12, %p327_p11 }
  0x20   :  { %v281_v16 = vld [vmem:[#allocation5] sm:$0xff]  }
  0x21   :  { %p330_p0 = pnand %p329_p13, %p323_p10 }
  0x24   :  { %246 = vmatpush3.bf16.xpose.msra.mxu0 %v269_v3 }
  0x25   :  { %247 = vmatprep.subr.bf16.mxu0 %v270_v4 }
  0x2c   :  { %248 = vmatpush3.bf16.xpose.msra.mxu0 %v271_v5 }
  0x2d   :  { %249 = vmatprep.subr.bf16.mxu0 %v272_v6 }
  0x34   :  { %250 = vmatpush3.bf16.xpose.msra.mxu0 %v273_v8 }
  0x35   :  { %251 = vmatprep.subr.bf16.mxu0 %v274_v9 }
  0x3c   :  { %252 = vmatpush3.bf16.xpose.msra.mxu0 %v275_v10 }
  0x3d   :  { %253 = vmatprep.subr.bf16.mxu0 %v276_v11 }
  0x44   :  { %254 = vmatpush3.bf16.xpose.msra.mxu0 %v277_v12 }
  0x45   :  { %255 = vmatprep.subr.bf16.mxu0 %v278_v13 }
  0x4c   :  { %256 = vmatpush3.bf16.xpose.msra.mxu0 %v279_v14 }
  0x4d   :  { %257 = vmatprep.subr.bf16.mxu0 %v280_v15 }
  0x54   :  { %258 = vmatpush3.bf16.xpose.msra.mxu0 %v281_v16 }
  0x5b   :  { %260 = vmatmul.mubr.bf16.vlgmr.msra.gmra.mxu0 %v39_v7 }
 0x11b   :  { %v202_v17 = vpop.f32.mrf.mxu0 }
 0x11c   :  { %209 = vst [vmem:[#allocation7] sm:$0xff] %v202_v17 }
 0x11d   :  { %v204_v18 = vpop.f32.mrf.mxu0 }
 0x11e   :  { %210 = vst [vmem:[#allocation7 + $0x8] sm:$0xff] %v204_v18 }
 0x11f   :  { %v206_v19 = vpop.f32.mrf.mxu0 }
 0x120   :  { %333 = shalt.err (!%p330_p0)
}
 0x121   :  { %220 = dma.vmem_to_hbm [thread:$0]  %s218_s1, 256, %s379_s2, [#allocation4]   ;;  %v207_v20 = vpop.f32.mrf.mxu0 }
 0x122   :  { %346 = dma.done.wait [#allocation4], 256  }
 0x123   :  { %347 = vsyncadd [#allocation4], 4294967040 }
 0x124   :  { %224 = vsyncpa [#allocation3], 1 }
 0x125   :  { %225 = vsyncpa [#allocation6], 1 }
 0x126   :  { %226 = vsyncpa [#allocation4], 1 }

</bundles_post_ra>
